<compile_context>
chip_gen: v7x
topology: tpu7x:2x2x1
jax: 0.10.0
libtpu: 0.0.40
codegen_flags: <defaults>
</compile_context>

<pallas_src>
import functools
import math

import jax
import jax.numpy as jnp
from jax.experimental import pallas as pl
from jax.experimental.pallas import tpu as pltpu

LN_EPS = 1e-5  # PyTorch nn.LayerNorm default


def single_to_pair_kernel(
    single_ref, lnw_ref, lnb_ref, actw_ref, actb_ref,
    wp_ref, wd_ref, pairb_ref,
    out_ref,
    q_s, k_s, qd_s, kd_s,
    *, ti, c_half):
    """Grid = (batch, i_blocks). Scratch caches per-batch projections."""
    ib = pl.program_id(1)

    # ---- once per batch: LayerNorm -> single_act -> q/k split + rank-1 terms
    @pl.when(ib == 0)
    def _():
        x = single_ref[0].astype(jnp.float32)                     # (L, D_in)
        mu = jnp.mean(x, axis=-1, keepdims=True)
        var = jnp.mean(jnp.square(x - mu), axis=-1, keepdims=True)
        xn = (x - mu) * jax.lax.rsqrt(var + LN_EPS)
        xn = xn * lnw_ref[...] + lnb_ref[...]
        h = jnp.dot(xn, actw_ref[...],
                    preferred_element_type=jnp.float32) + actb_ref[...]  # (L, C)
        q = h[:, :c_half]                                          # (L, C/2)
        k = h[:, c_half:]                                          # (L, C/2)
        q_s[...] = q
        k_s[...] = k
        # diff half of pair_act is rank-1 structured: (q_j - k_i) @ Wd
        qd_s[...] = jnp.dot(q, wd_ref[...], preferred_element_type=jnp.float32)
        kd_s[...] = jnp.dot(k, wd_ref[...], preferred_element_type=jnp.float32)

    # ---- per i-block bilinear term + recombination
    i0 = pl.multiple_of(ib * ti, ti)
    q = q_s[...]                                                   # (L, C/2)
    k_blk = k_s[pl.ds(i0, ti), :]                                  # (TI, C/2)
    kd_blk = kd_s[pl.ds(i0, ti), :]                                # (TI, OUT)

    L = q.shape[0]
    prod = q[None, :, :] * k_blk[:, None, :]                       # (TI, L, C/2)
    pp = jnp.dot(prod.reshape(ti * L, c_half), wp_ref[...],
                 preferred_element_type=jnp.float32)               # (TI*L, OUT)
    pp = pp.reshape(ti, L, -1)                                     # (TI, L, OUT)

    out = pp + qd_s[...][None, :, :] - kd_blk[:, None, :] + pairb_ref[...]
    out_ref[0] = out.astype(out_ref.dtype)                         # (TI, L, OUT)


def single_to_pair(single, params, *, ti=None):
    """Pallas forward of SingleToPairModule. single: [B, L, D_in] -> [B, L, L, OUT]."""
    B, L, D_in = single.shape
    C = params["act_w"].shape[1]
    assert C % 2 == 0, "single_channel must be even (chunk(2, -1))"
    C2 = C // 2
    OUT = params["pair_w"].shape[1]

    if ti is None:
        ti = min(L, 128)            # bounds O(L^2) output tile in VMEM
    assert L % ti == 0, (L, ti)
    n_i = L // ti

    f32 = jnp.float32
    ln_w = params["ln_w"].reshape(1, D_in).astype(f32)
    ln_b = params["ln_b"].reshape(1, D_in).astype(f32)
    act_w = params["act_w"].astype(f32)
    act_b = params["act_b"].reshape(1, C).astype(f32)
    wp = params["pair_w"][:C2].astype(f32)      # rows matching `prod`
    wd = params["pair_w"][C2:].astype(f32)      # rows matching `diff`
    pair_b = params["pair_b"].reshape(1, OUT).astype(f32)

    kernel = functools.partial(single_to_pair_kernel, ti=ti, c_half=C2)

    out = pl.pallas_call(
        kernel,
        out_shape=jax.ShapeDtypeStruct((B, L, L, OUT), jnp.float32),
        grid_spec=pltpu.PrefetchScalarGridSpec(
            num_scalar_prefetch=0,
            grid=(B, n_i),
            in_specs=[
                pl.BlockSpec((1, L, D_in), lambda b, i: (b, 0, 0)),   # single
                pl.BlockSpec((1, D_in), lambda b, i: (0, 0)),         # ln w
                pl.BlockSpec((1, D_in), lambda b, i: (0, 0)),         # ln b
                pl.BlockSpec((D_in, C), lambda b, i: (0, 0)),         # single_act w
                pl.BlockSpec((1, C), lambda b, i: (0, 0)),            # single_act b
                pl.BlockSpec((C2, OUT), lambda b, i: (0, 0)),         # pair_act W (prod rows)
                pl.BlockSpec((C2, OUT), lambda b, i: (0, 0)),         # pair_act W (diff rows)
                pl.BlockSpec((1, OUT), lambda b, i: (0, 0)),          # pair_act b
            ],
            out_specs=pl.BlockSpec((1, ti, L, OUT), lambda b, i: (b, i, 0, 0)),
            scratch_shapes=[
                pltpu.VMEM((L, C2), jnp.float32),   # q
                pltpu.VMEM((L, C2), jnp.float32),   # k
                pltpu.VMEM((L, OUT), jnp.float32),  # q @ Wd
                pltpu.VMEM((L, OUT), jnp.float32),  # k @ Wd
            ],
        ),
        compiler_params=pltpu.CompilerParams(
            dimension_semantics=("parallel", "arbitrary")),
    )(single, ln_w, ln_b, act_w, act_b, wp, wd, pair_b)
    return out


def reference(single, params):
    """Pure-JAX transcription of the PyTorch forward (for correctness check)."""
    x = single.astype(jnp.float32)
    mu = jnp.mean(x, axis=-1, keepdims=True)
    var = jnp.mean(jnp.square(x - mu), axis=-1, keepdims=True)
    xn = (x - mu) * jax.lax.rsqrt(var + LN_EPS) * params["ln_w"] + params["ln_b"]
    h = xn @ params["act_w"] + params["act_b"]
    C2 = h.shape[-1] // 2
    q, k = h[..., :C2], h[..., C2:]
    prod = q[:, None, :, :] * k[:, :, None, :]
    diff = q[:, None, :, :] - k[:, :, None, :]
    pair = jnp.concatenate([prod, diff], axis=-1)
    return pair @ params["pair_w"] + params["pair_b"]


def make_params(key, *, d_in, c, out_dim):
    ks = jax.random.split(key, 6)
    n = lambda k, shp, s: jax.random.normal(k, shp, jnp.float32) * s
    return {
        "ln_w": 1.0 + n(ks[0], (d_in,), 0.1),
        "ln_b": n(ks[1], (d_in,), 0.1),
        "act_w": n(ks[2], (d_in, c), 1.0 / math.sqrt(d_in)),
        "act_b": n(ks[3], (c,), 0.1),
        "pair_w": n(ks[4], (c, out_dim), 1.0 / math.sqrt(c)),
        "pair_b": n(ks[5], (out_dim,), 0.1),
    }


if __name__ == "__main__":
    # Small config consistent with the module:
    # single_in_dim=16, single_channel=32, pair_out_dim=32, batch=2, seq=8.
    B, L, D_IN = 2, 8, 16
    C, OUT = 32, 32

    key = jax.random.PRNGKey(0)
    k_x, k_p = jax.random.split(key)
    single = jax.random.normal(k_x, (B, L, D_IN), jnp.float32)
    params = make_params(k_p, d_in=D_IN, c=C, out_dim=OUT)

    out = single_to_pair(single, params)
    out = jax.block_until_ready(out)

    ref = reference(single, params)
    assert out.shape == (B, L, L, OUT), out.shape
    assert jnp.allclose(out, ref, atol=1e-4, rtol=1e-4), \
        float(jnp.max(jnp.abs(out - ref)))

    print("KERNEL_OK")
</pallas_src>

<mosaic_0001>
module attributes {stable_mosaic.version = 11 : i64} {
  func.func @single_to_pair_kernel(%arg0: i32, %arg1: i32, %arg2: memref<1x8x16xf32, #tpu.memory_space<vmem>>, %arg3: memref<1x16xf32, #tpu.memory_space<vmem>>, %arg4: memref<1x16xf32, #tpu.memory_space<vmem>>, %arg5: memref<16x32xf32, #tpu.memory_space<vmem>>, %arg6: memref<1x32xf32, #tpu.memory_space<vmem>>, %arg7: memref<16x32xf32, #tpu.memory_space<vmem>>, %arg8: memref<16x32xf32, #tpu.memory_space<vmem>>, %arg9: memref<1x32xf32, #tpu.memory_space<vmem>>, %arg10: memref<1x8x8x32xf32, #tpu.memory_space<vmem>>, %arg11: memref<8x16xf32, #tpu.memory_space<vmem>>, %arg12: memref<8x16xf32, #tpu.memory_space<vmem>>, %arg13: memref<8x32xf32, #tpu.memory_space<vmem>>, %arg14: memref<8x32xf32, #tpu.memory_space<vmem>>) attributes {dimension_semantics = [#tpu.dimension_semantics<parallel>, #tpu.dimension_semantics<arbitrary>], iteration_bounds = array<i64: 2, 1>, scalar_prefetch = 0 : i64, scratch_operands = 4 : i64, tpu.core_type = #tpu.core_type<tc>, window_params = [{transform_indices = @transform_0, window_bounds = array<i64: 1, 8, 16>}, {pipeline_mode = #tpu.pipeline_mode<synchronous>, transform_indices = @transform_1, window_bounds = array<i64: 1, 16>}, {pipeline_mode = #tpu.pipeline_mode<synchronous>, transform_indices = @transform_2, window_bounds = array<i64: 1, 16>}, {pipeline_mode = #tpu.pipeline_mode<synchronous>, transform_indices = @transform_3, window_bounds = array<i64: 16, 32>}, {pipeline_mode = #tpu.pipeline_mode<synchronous>, transform_indices = @transform_4, window_bounds = array<i64: 1, 32>}, {pipeline_mode = #tpu.pipeline_mode<synchronous>, transform_indices = @transform_5, window_bounds = array<i64: 16, 32>}, {pipeline_mode = #tpu.pipeline_mode<synchronous>, transform_indices = @transform_6, window_bounds = array<i64: 16, 32>}, {pipeline_mode = #tpu.pipeline_mode<synchronous>, transform_indices = @transform_7, window_bounds = array<i64: 1, 32>}, {transform_indices = @transform_8, window_bounds = array<i64: 1, 8, 8, 32>}]} {
    %c0_i32 = arith.constant 0 : i32
    %0 = arith.cmpi eq, %arg1, %c0_i32 : i32
    %1 = arith.extui %0 : i1 to i32
    %c0_i32_0 = arith.constant 0 : i32
    %2 = arith.cmpi ne, %1, %c0_i32_0 : i32
    scf.if %2 {
      %c0_14 = arith.constant 0 : index
      %c0_15 = arith.constant 0 : index
      %c0_16 = arith.constant 0 : index
      %33 = vector.load %arg2[%c0_14, %c0_15, %c0_16] : memref<1x8x16xf32, #tpu.memory_space<vmem>>, vector<1x8x16xf32>
      %34 = vector.shape_cast %33 : vector<1x8x16xf32> to vector<8x16xf32>
      %cst_17 = arith.constant dense<0.000000e+00> : vector<8xf32>
      %35 = vector.multi_reduction <add>, %34, %cst_17 [1] : vector<8x16xf32> to vector<8xf32>
      %36 = vector.shape_cast %35 : vector<8xf32> to vector<8x1xf32>
      %cst_18 = arith.constant 1.600000e+01 : f32
      %37 = vector.broadcast %cst_18 : f32 to vector<8x1xf32>
      %38 = arith.divf %36, %37 : vector<8x1xf32>
      %39 = vector.broadcast %38 : vector<8x1xf32> to vector<8x16xf32>
      %40 = arith.subf %34, %39 : vector<8x16xf32>
      %41 = arith.mulf %40, %40 : vector<8x16xf32>
      %cst_19 = arith.constant dense<0.000000e+00> : vector<8xf32>
      %42 = vector.multi_reduction <add>, %41, %cst_19 [1] : vector<8x16xf32> to vector<8xf32>
      %43 = vector.shape_cast %42 : vector<8xf32> to vector<8x1xf32>
      %cst_20 = arith.constant 1.600000e+01 : f32
      %44 = vector.broadcast %cst_20 : f32 to vector<8x1xf32>
      %45 = arith.divf %43, %44 : vector<8x1xf32>
      %46 = vector.broadcast %38 : vector<8x1xf32> to vector<8x16xf32>
      %47 = arith.subf %34, %46 : vector<8x16xf32>
      %cst_21 = arith.constant 9.99999974E-6 : f32
      %48 = vector.broadcast %cst_21 : f32 to vector<8x1xf32>
      %49 = arith.addf %45, %48 : vector<8x1xf32>
      %50 = math.rsqrt %49 : vector<8x1xf32>
      %51 = vector.broadcast %50 : vector<8x1xf32> to vector<8x16xf32>
      %52 = arith.mulf %47, %51 : vector<8x16xf32>
      %c0_22 = arith.constant 0 : index
      %c0_23 = arith.constant 0 : index
      %53 = vector.load %arg3[%c0_22, %c0_23] : memref<1x16xf32, #tpu.memory_space<vmem>>, vector<1x16xf32>
      %54 = vector.broadcast %53 : vector<1x16xf32> to vector<8x16xf32>
      %55 = arith.mulf %52, %54 : vector<8x16xf32>
      %c0_24 = arith.constant 0 : index
      %c0_25 = arith.constant 0 : index
      %56 = vector.load %arg4[%c0_24, %c0_25] : memref<1x16xf32, #tpu.memory_space<vmem>>, vector<1x16xf32>
      %57 = vector.broadcast %56 : vector<1x16xf32> to vector<8x16xf32>
      %58 = arith.addf %55, %57 : vector<8x16xf32>
      %c0_26 = arith.constant 0 : index
      %c0_27 = arith.constant 0 : index
      %59 = vector.load %arg5[%c0_26, %c0_27] : memref<16x32xf32, #tpu.memory_space<vmem>>, vector<16x32xf32>
      %cst_28 = arith.constant dense<0.000000e+00> : vector<8x32xf32>
      %60 = tpu.matmul %58, %59, %cst_28 {dimension_numbers = #tpu.dot_dimension_numbers<[1], [0], [0], [1], [0, 0, 1, 1], [], []>} : vector<8x16xf32>, vector<16x32xf32>, vector<8x32xf32> -> vector<8x32xf32>
      %c0_29 = arith.constant 0 : index
      %c0_30 = arith.constant 0 : index
      %61 = vector.load %arg6[%c0_29, %c0_30] : memref<1x32xf32, #tpu.memory_space<vmem>>, vector<1x32xf32>
      %62 = vector.broadcast %61 : vector<1x32xf32> to vector<8x32xf32>
      %63 = arith.addf %60, %62 : vector<8x32xf32>
      %64 = vector.extract_strided_slice %63 {offsets = [0, 0], sizes = [8, 16], strides = [1, 1]} : vector<8x32xf32> to vector<8x16xf32>
      %65 = vector.extract_strided_slice %63 {offsets = [0, 16], sizes = [8, 16], strides = [1, 1]} : vector<8x32xf32> to vector<8x16xf32>
      %c0_31 = arith.constant 0 : index
      %c0_32 = arith.constant 0 : index
      %66 = vector.load %arg11[%c0_31, %c0_32] : memref<8x16xf32, #tpu.memory_space<vmem>>, vector<8x16xf32>
      tpu.vector_store %arg11[%c0_31, %c0_32], %64 {strides = array<i32>} : memref<8x16xf32, #tpu.memory_space<vmem>>, vector<8x16xf32>,
      %c0_33 = arith.constant 0 : index
      %c0_34 = arith.constant 0 : index
      %67 = vector.load %arg12[%c0_33, %c0_34] : memref<8x16xf32, #tpu.memory_space<vmem>>, vector<8x16xf32>
      tpu.vector_store %arg12[%c0_33, %c0_34], %65 {strides = array<i32>} : memref<8x16xf32, #tpu.memory_space<vmem>>, vector<8x16xf32>,
      %c0_35 = arith.constant 0 : index
      %c0_36 = arith.constant 0 : index
      %68 = vector.load %arg8[%c0_35, %c0_36] : memref<16x32xf32, #tpu.memory_space<vmem>>, vector<16x32xf32>
      %cst_37 = arith.constant dense<0.000000e+00> : vector<8x32xf32>
      %69 = tpu.matmul %64, %68, %cst_37 {dimension_numbers = #tpu.dot_dimension_numbers<[1], [0], [0], [1], [0, 0, 1, 1], [], []>} : vector<8x16xf32>, vector<16x32xf32>, vector<8x32xf32> -> vector<8x32xf32>
      %c0_38 = arith.constant 0 : index
      %c0_39 = arith.constant 0 : index
      %70 = vector.load %arg13[%c0_38, %c0_39] : memref<8x32xf32, #tpu.memory_space<vmem>>, vector<8x32xf32>
      tpu.vector_store %arg13[%c0_38, %c0_39], %69 {strides = array<i32>} : memref<8x32xf32, #tpu.memory_space<vmem>>, vector<8x32xf32>,
      %c0_40 = arith.constant 0 : index
      %c0_41 = arith.constant 0 : index
      %71 = vector.load %arg8[%c0_40, %c0_41] : memref<16x32xf32, #tpu.memory_space<vmem>>, vector<16x32xf32>
      %cst_42 = arith.constant dense<0.000000e+00> : vector<8x32xf32>
      %72 = tpu.matmul %65, %71, %cst_42 {dimension_numbers = #tpu.dot_dimension_numbers<[1], [0], [0], [1], [0, 0, 1, 1], [], []>} : vector<8x16xf32>, vector<16x32xf32>, vector<8x32xf32> -> vector<8x32xf32>
      %c0_43 = arith.constant 0 : index
      %c0_44 = arith.constant 0 : index
      %73 = vector.load %arg14[%c0_43, %c0_44] : memref<8x32xf32, #tpu.memory_space<vmem>>, vector<8x32xf32>
      tpu.vector_store %arg14[%c0_43, %c0_44], %72 {strides = array<i32>} : memref<8x32xf32, #tpu.memory_space<vmem>>, vector<8x32xf32>,
    } else {
    }
    %c8_i32 = arith.constant 8 : i32
    %3 = arith.muli %arg1, %c8_i32 : i32
    %4 = tpu.assume_multiple %3, 8 : i32
    %c0 = arith.constant 0 : index
    %c0_1 = arith.constant 0 : index
    %5 = vector.load %arg11[%c0, %c0_1] : memref<8x16xf32, #tpu.memory_space<vmem>>, vector<8x16xf32>
    %6 = arith.index_cast %4 : i32 to index
    %c0_2 = arith.constant 0 : index
    %7 = vector.load %arg12[%6, %c0_2] : memref<8x16xf32, #tpu.memory_space<vmem>>, vector<8x16xf32>
    %8 = arith.index_cast %4 : i32 to index
    %c0_3 = arith.constant 0 : index
    %9 = vector.load %arg14[%8, %c0_3] : memref<8x32xf32, #tpu.memory_space<vmem>>, vector<8x32xf32>
    %10 = vector.shape_cast %5 : vector<8x16xf32> to vector<1x8x16xf32>
    %11 = vector.shape_cast %7 : vector<8x16xf32> to vector<8x1x16xf32>
    %12 = vector.broadcast %10 : vector<1x8x16xf32> to vector<8x8x16xf32>
    %13 = vector.broadcast %11 : vector<8x1x16xf32> to vector<8x8x16xf32>
    %14 = arith.mulf %12, %13 : vector<8x8x16xf32>
    %15 = vector.shape_cast %14 : vector<8x8x16xf32> to vector<64x16xf32>
    %c0_4 = arith.constant 0 : index
    %c0_5 = arith.constant 0 : index
    %16 = vector.load %arg7[%c0_4, %c0_5] : memref<16x32xf32, #tpu.memory_space<vmem>>, vector<16x32xf32>
    %cst = arith.constant dense<0.000000e+00> : vector<64x32xf32>
    %17 = tpu.matmul %15, %16, %cst {dimension_numbers = #tpu.dot_dimension_numbers<[1], [0], [0], [1], [0, 0, 1, 1], [], []>} : vector<64x16xf32>, vector<16x32xf32>, vector<64x32xf32> -> vector<64x32xf32>
    %18 = vector.shape_cast %17 : vector<64x32xf32> to vector<8x8x32xf32>
    %c0_6 = arith.constant 0 : index
    %c0_7 = arith.constant 0 : index
    %19 = vector.load %arg13[%c0_6, %c0_7] : memref<8x32xf32, #tpu.memory_space<vmem>>, vector<8x32xf32>
    %20 = vector.shape_cast %19 : vector<8x32xf32> to vector<1x8x32xf32>
    %21 = vector.broadcast %20 : vector<1x8x32xf32> to vector<8x8x32xf32>
    %22 = arith.addf %18, %21 : vector<8x8x32xf32>
    %23 = vector.shape_cast %9 : vector<8x32xf32> to vector<8x1x32xf32>
    %24 = vector.broadcast %23 : vector<8x1x32xf32> to vector<8x8x32xf32>
    %25 = arith.subf %22, %24 : vector<8x8x32xf32>
    %c0_8 = arith.constant 0 : index
    %c0_9 = arith.constant 0 : index
    %26 = vector.load %arg9[%c0_8, %c0_9] : memref<1x32xf32, #tpu.memory_space<vmem>>, vector<1x32xf32>
    %27 = vector.shape_cast %26 : vector<1x32xf32> to vector<1x1x32xf32>
    %28 = vector.broadcast %27 : vector<1x1x32xf32> to vector<8x8x32xf32>
    %29 = arith.addf %25, %28 : vector<8x8x32xf32>
    %c0_10 = arith.constant 0 : index
    %c0_11 = arith.constant 0 : index
    %c0_12 = arith.constant 0 : index
    %c0_13 = arith.constant 0 : index
    %30 = vector.load %arg10[%c0_10, %c0_11, %c0_12, %c0_13] : memref<1x8x8x32xf32, #tpu.memory_space<vmem>>, vector<1x8x8x32xf32>
    %31 = vector.shape_cast %30 : vector<1x8x8x32xf32> to vector<8x8x32xf32>
    %32 = vector.shape_cast %29 : vector<8x8x32xf32> to vector<1x8x8x32xf32>
    tpu.vector_store %arg10[%c0_10, %c0_11, %c0_12, %c0_13], %32 {strides = array<i32>} : memref<1x8x8x32xf32, #tpu.memory_space<vmem>>, vector<1x8x8x32xf32>,
    return
  }
  func.func @transform_0(%arg0: i32, %arg1: i32) -> (i32, i32, i32) {
    %c0_i32 = arith.constant 0 : i32
    %c0_i32_0 = arith.constant 0 : i32
    %c0_i32_1 = arith.constant 0 : i32
    return %arg0, %c0_i32, %c0_i32_0 : i32, i32, i32
  }
  func.func @transform_1(%arg0: i32, %arg1: i32) -> (i32, i32) {
    %c0_i32 = arith.constant 0 : i32
    %c0_i32_0 = arith.constant 0 : i32
    %c0_i32_1 = arith.constant 0 : i32
    return %c0_i32, %c0_i32_0 : i32, i32
  }
  func.func @transform_2(%arg0: i32, %arg1: i32) -> (i32, i32) {
    %c0_i32 = arith.constant 0 : i32
    %c0_i32_0 = arith.constant 0 : i32
    %c0_i32_1 = arith.constant 0 : i32
    return %c0_i32, %c0_i32_0 : i32, i32
  }
  func.func @transform_3(%arg0: i32, %arg1: i32) -> (i32, i32) {
    %c0_i32 = arith.constant 0 : i32
    %c0_i32_0 = arith.constant 0 : i32
    %c0_i32_1 = arith.constant 0 : i32
    return %c0_i32, %c0_i32_0 : i32, i32
  }
  func.func @transform_4(%arg0: i32, %arg1: i32) -> (i32, i32) {
    %c0_i32 = arith.constant 0 : i32
    %c0_i32_0 = arith.constant 0 : i32
    %c0_i32_1 = arith.constant 0 : i32
    return %c0_i32, %c0_i32_0 : i32, i32
  }
  func.func @transform_5(%arg0: i32, %arg1: i32) -> (i32, i32) {
    %c0_i32 = arith.constant 0 : i32
    %c0_i32_0 = arith.constant 0 : i32
    %c0_i32_1 = arith.constant 0 : i32
    return %c0_i32, %c0_i32_0 : i32, i32
  }
  func.func @transform_6(%arg0: i32, %arg1: i32) -> (i32, i32) {
    %c0_i32 = arith.constant 0 : i32
    %c0_i32_0 = arith.constant 0 : i32
    %c0_i32_1 = arith.constant 0 : i32
    return %c0_i32, %c0_i32_0 : i32, i32
  }
  func.func @transform_7(%arg0: i32, %arg1: i32) -> (i32, i32) {
    %c0_i32 = arith.constant 0 : i32
    %c0_i32_0 = arith.constant 0 : i32
    %c0_i32_1 = arith.constant 0 : i32
    return %c0_i32, %c0_i32_0 : i32, i32
  }
  func.func @transform_8(%arg0: i32, %arg1: i32) -> (i32, i32, i32, i32) {
    %c0_i32 = arith.constant 0 : i32
    %c0_i32_0 = arith.constant 0 : i32
    %c0_i32_1 = arith.constant 0 : i32
    return %arg0, %arg1, %c0_i32, %c0_i32_0 : i32, i32, i32, i32
  }
}

</mosaic_0001>

<bundles_post_ra>
// kernel: tpu_custom_call.1
= control target key start
LH: loop header
LB: loop body
LE: loop exit
PB: predicated region body
PF: predicated region fallthrough
CT: control target
= control target key end

     0   :  { %s1999_s0 = inlined_call_operand.hbm [shape: f32[2,8,16], index: 0, kind: input, shape index: {}]   ;;  %s2000_s1 = inlined_call_operand.vmem [shape: f32[1,16], index: 1, kind: input, shape index: {}]   ;;  %s2001_s2 = inlined_call_operand.vmem [shape: f32[1,16], index: 2, kind: input, shape index: {}]   ;;  %s2002_s3 = inlined_call_operand.hbm [shape: f32[16,32], index: 3, kind: input, shape index: {}]   ;;  %s2003_s4 = inlined_call_operand.hbm [shape: f32[1,32], index: 4, kind: input, shape index: {}]   ;;  %s2004_s5 = inlined_call_operand.vmem [shape: f32[16,32], index: 5, kind: input, shape index: {}]   ;;  %s2005_s6 = inlined_call_operand.hbm [shape: f32[16,32], index: 6, kind: input, shape index: {}]   ;;  %s2006_s7 = inlined_call_operand.vmem [shape: f32[1,32], index: 7, kind: input, shape index: {}]   ;;  %s2007_s8 = inlined_call_operand.hbm [shape: f32[2,8,8,32], index: 8, kind: output, shape index: {}]  }
   0x1   :  { %2015 = sst [smem:[#allocation22_spill]] %s2006_s7 }
   0x2   :  { %2016 = sst [smem:[#allocation23_spill]] %s2007_s8 }
   0x3   :  { %13 = vsyncpa [#allocation7], 0 }
   0x4   :  { %15 = vsyncpa [#allocation7 + $0x1], 0 }
   0x5   :  { %16 = vsyncpa [#allocation10], 0 }
   0x6   :  { %17 = vsyncpa [#allocation13], 0 }
   0x7   :  { %18 = vsyncpa [#allocation8], 0 }
   0x8   :  { %20 = vsyncpa [#allocation8 + $0x1], 0  ;;  %s1628_s27 = smov 0   ;;  %s1630_s28 = smov 0  }
   0x9   :  { %s1632_s29 = smov 0   ;;  %s1634_s30 = smov 0  }
   0xa   :  { %s1636_s9 = smov 0   ;;  %s1638_s10 = smov 0  }
   0xb LB: > { %2017 = sst [smem:[#allocation19_spill]] %s1547_s27  ;;  %s1153_s11 = sadd.s32 4294967295, %s1567_s10   ;;  %s1567_s10 = sphi %s1638_s10, %s26_s10   ;;  %s1563_s9 = sphi %s1636_s9, %s2044_s9   ;;  %s1559_s30 = sphi %s1634_s30, %s2043_s30   ;;  %s1555_s29 = sphi %s1632_s29, %s2042_s29   ;;  %s1551_s28 = sphi %s1630_s28, %s2041_s28   ;;  %s1547_s27 = sphi %s1628_s27, %s2040_s27  }
   0xc   : > { %2018 = sst [smem:[#allocation20_spill]] %s1559_s30  ;;  %s1154_s12 = sadd.s32 4294967294, %s1567_s10  }
   0xd   : > { %p58_p0 = scmp.ne.s32.totalorder %s1551_s28, %s1547_s27  ;;  %p1662_p1 = scmp.eq.s32.totalorder %s1153_s11, 0 }
   0xe   : > { %p1666_p2 = scmp.eq.s32.totalorder %s1153_s11, 1  ;;  %p237_p3 = scmp.eq.s32.totalorder %s1154_s12, 1 }
   0xf   : > { %s2019_s13 = scalar_select %p1662_p1, 1, 0 }
  0x10   : > { %s2020_s14 = scalar_select %p1666_p2, 1, 0 }
  0x11   : > { %p1672_p4 = por %p1662_p1, %p58_p0  ;;  %p1155_p5 = scmp.ge.s32.totalorder %s1567_s10, 1 }
  0x12   : > { %p1677_p6 = por %p237_p3, %p58_p0  ;;  %p244_p7 = scmp.lt.s32.totalorder %s1567_s10, 3 }
  0x13   : > { %s2021_s15 = scalar_select %p1672_p4, 1, 0 }
  0x14   : > { %s2022_s16 = scalar_select %p1677_p6, 1, 0 }
  0x15   : > { %p1682_p8 = pnand %p1155_p5, %p244_p7  ;;  %s1569_s18 = smov [#allocation9]  }
  0x16   : > { %2023 = sst [smem:[#allocation21_spill]] %s2022_s16  ;;  %s262_s19 = sshll.u32 %s1569_s18, 4  ;;  %s1686_s19 = int_to_ptr.vmem [resolvable:$true] %s262_s19 }
  0x17   : > { %s2024_s17 = scalar_select %p1682_p8, 1, 0 }
  0x18   : > { %p1274_p9 = pneg %p1682_p8  ;;  %s1570_s21 = smov [#allocation11]  }
  0x19   : > { %s276_s22 = sshll.u32 %s1570_s21, 4  ;;  %s1571_s23 = smov [#allocation12]   ;;  %s1697_s22 = int_to_ptr.vmem [resolvable:$true] %s276_s22 }
  0x1a   : > { %p1693_p11 = pnand %p1274_p9, %p1662_p1  ;;  %s1699_s24 = sshll.u32 %s1571_s23, 4  ;;  %s290_s24 = int_to_ptr.vmem [resolvable:$true] %s1699_s24 }
  0x1b   : > { %s1363_s11 = scalar_lea.hbm %s2002_s3, 256 }
  0x1c   : > { %p1364_p12 = scmp.ne.s32.totalorder %s2002_s3, %s1363_s11  ;;  %p1709_p13 = pneg %p1693_p11 }
  0x1d   : > { %p1370_p5 = scmp.lt.u32.totalorder %s1363_s11, %s2002_s3 }
  0x1e   : > { %p1366_p0 = pnand %p1709_p13, %p1364_p12 }
  0x20   : > { %p1367_p3 = pneg %p1366_p0 }
  0x22   : > { %p1372_p7 = pnand %p1370_p5, %p1367_p3 }
  0x24   : > { %1375 = shalt.err (!%p1372_p7)
}
  0x25   : > { %s1376_s25 = scalar_lea.vmem %s1686_s19, 256  ;;  %p1384_p1 = scmp.lt.s32.totalorder %s1686_s19, %s1686_s19 }
  0x26   : > { %p1377_p9 = scmp.ne.s32.totalorder %s1686_s19, %s1376_s25  ;;  %p1385_p4 = scmp.lt.s32.totalorder %s1376_s25, %s1376_s25 }
  0x28   : > { %p1379_p10 = pnand %p1377_p9, %p1709_p13  ;;  %p1386_p12 = por %p1385_p4, %p1384_p1 }
  0x2a   : > { %p1380_p6 = pneg %p1379_p10 }
  0x2c   : > { %p1387_p0 = pnand %p1386_p12, %p1380_p6 }
  0x2e   : > { %1390 = shalt.err (!%p1387_p0)
}
  0x2f   : > { %s1572_s26 = smov 128   ;;  %s1573_s11 = smov 8  }
  0x30   : > { %1277 = dma.hbm_to_vmem [thread:$0]  (!%p1693_p11), %s2002_s3, 256, %s1686_s19, [#allocation10], %s1572_s26, %s1572_s26, %s1573_s11  }
  0x31   : > { %s1391_s25 = scalar_lea.hbm %s2003_s4, 16 }
  0x32   : > { %p1392_p1 = scmp.ne.s32.totalorder %s2003_s4, %s1391_s25  ;;  %p1398_p10 = scmp.lt.u32.totalorder %s1391_s25, %s2003_s4 }
  0x34   : > { %p1394_p4 = pnand %p1392_p1, %p1709_p13 }
  0x36   : > { %p1395_p6 = pneg %p1394_p4 }
  0x38   : > { %p1400_p3 = pnand %p1398_p10, %p1395_p6 }
  0x3a   : > { %1403 = shalt.err (!%p1400_p3)
}
  0x3b   : > { %s1404_s19 = scalar_lea.vmem %s1697_s22, 16  ;;  %s1411_s8 = scalar_lea.vmem %s1697_s22, 32 }
  0x3c   : > { %p1405_p5 = scmp.ne.s32.totalorder %s1697_s22, %s1404_s19  ;;  %p1412_p12 = scmp.lt.s32.totalorder %s1697_s22, %s1697_s22 }
  0x3d   : > { %p1413_p0 = scmp.lt.s32.totalorder %s1411_s8, %s1404_s19 }
  0x3e   : > { %p1407_p7 = pnand %p1405_p5, %p1709_p13 }
  0x3f   : > { %p1414_p1 = por %p1413_p0, %p1412_p12 }
  0x40   : > { %p1408_p9 = pneg %p1407_p7 }
  0x42   : > { %p1415_p4 = pnand %p1414_p1, %p1408_p9 }
  0x44   : > { %1418 = shalt.err (!%p1415_p4)
}
  0x45   : > { %1280 = dma.hbm_to_vmem [thread:$0]  (!%p1693_p11), %s2003_s4, 16, %s1697_s22, [#allocation10]  }
  0x46   : > { %s1419_s18 = scalar_lea.hbm %s2005_s6, 256 }
  0x47   : > { %p1420_p6 = scmp.ne.s32.totalorder %s2005_s6, %s1419_s18  ;;  %p1426_p5 = scmp.lt.u32.totalorder %s1419_s18, %s2005_s6 }
  0x49   : > { %p1422_p10 = pnand %p1420_p6, %p1709_p13 }
  0x4b   : > { %p1423_p3 = pneg %p1422_p10 }
  0x4d   : > { %p1428_p7 = pnand %p1426_p5, %p1423_p3 }
  0x4f   : > { %1431 = shalt.err (!%p1428_p7)
}
  0x50   : > { %s1432_s8 = scalar_lea.vmem %s290_s24, 256  ;;  %p1440_p1 = scmp.lt.s32.totalorder %s290_s24, %s290_s24 }
  0x51   : > { %p1433_p9 = scmp.ne.s32.totalorder %s290_s24, %s1432_s8  ;;  %p1441_p4 = scmp.lt.s32.totalorder %s1432_s8, %s1432_s8 }
  0x53   : > { %p1435_p12 = pnand %p1433_p9, %p1709_p13  ;;  %p1442_p8 = por %p1441_p4, %p1440_p1 }
  0x55   : > { %p1436_p0 = pneg %p1435_p12 }
  0x57   : > { %p1443_p2 = pnand %p1442_p8, %p1436_p0 }
  0x59   : > { %1446 = shalt.err (!%p1443_p2)
}
  0x5a   : > { %1283 = dma.hbm_to_vmem [thread:$0]  (!%p1693_p11), %s2005_s6, 256, %s290_s24, [#allocation13], %s1572_s26, %s1572_s26, %s1573_s11  }
  0x5b   : > { %s45_s16 = sadd.s32 1, %s1555_s29  ;;  %s38_s20 = sadd.s32 1, %s1563_s9 }
  0x5c   : > { %p52_p2 = scmp.ne.s32.totalorder %s1555_s29, %s1551_s28  ;;  %p40_p8 = scmp.ge.s32.totalorder %s38_s20, 2 }
  0x5d   : > { %p53_p13 = scmp.eq.s32.totalorder %s1567_s10, 0  ;;  %p2027_p6 = scmp.ne.s32.totalorder %s2020_s14, 0 }
  0x5e   : > { %p1295_p3 = scmp.lt.s32.totalorder %s1567_s10, 2  ;;  %s2046_s20 = smov (%p40_p8, %s38_s20), 0 }
  0x5f   : > { %p1786_p10 = por %p2027_p6, %p52_p2  ;;  %p54_p5 = por %p53_p13, %p52_p2 }
  0x60   : > { %s306_s30 = sand.u32 1, %s1555_s29   ;;  %s42_s12 = ssub.s32 %s1563_s9, %s2046_s20 }
  0x61   : > { %p43_p7 = scmp.eq.s32.totalorder %s42_s12, 0  ;;  %s1160_s24 = sshll.u32 %s306_s30, 3 }
  0x62   : > { %s1161_s26 = sshll.u32 %s1563_s9, 7  ;;  %s310_s23 = scalar_lea.vmem [#allocation6], %s1160_s24 }
  0x63   : > { %s1798_s11 = scalar_select %p43_p7, %s1555_s29, %s45_s16  }
  0x64   : > { %s1803_s14 = scalar_lea.hbm %s1999_s0, %s1161_s26  ;;  %s317_s25 = sshll.u32 %s310_s23, 4  ;;  %s1805_s25 = int_to_ptr.vmem [resolvable:$true] %s317_s25 }
  0x65   : > { %p1809_p11 = pnand %p1295_p3, %p54_p5  ;;  %s307_s8 = scalar_lea.sflag [#allocation7], %s306_s30 }
  0x66   : > { %s1447_s22 = scalar_lea.hbm %s1803_s14, 128  ;;  %s1452_s12 = scalar_lea.hbm %s1999_s0, 256 }
  0x67   : > { %p1448_p9 = scmp.ne.s32.totalorder %s1803_s14, %s1447_s22  ;;  %p1449_p12 = pneg %p1809_p11 }
  0x68   : > { %p1453_p4 = scmp.lt.u32.totalorder %s1803_s14, %s1999_s0  ;;  %p1454_p2 = scmp.lt.u32.totalorder %s1452_s12, %s1447_s22 }
  0x69   : > { %p1450_p0 = pnand %p1449_p12, %p1448_p9  ;;  %p1456_p13 = scmp.lt.u32.totalorder %s1447_s22, %s1803_s14 }
  0x6a   : > { %p1455_p8 = por %p1454_p2, %p1453_p4 }
  0x6b   : > { %p1451_p1 = pneg %p1450_p0 }
  0x6c   : > { %p1457_p6 = por %p1456_p13, %p1455_p8 }
  0x6e   : > { %p1458_p3 = pnand %p1457_p6, %p1451_p1 }
  0x70   : > { %1461 = shalt.err (!%p1458_p3)
}
  0x71   : > { %s1462_s30 = scalar_lea.vmem %s1805_s25, 128  ;;  %s1574_s18 = smov [#allocation6]  }
  0x72   : > { %p1463_p5 = scmp.ne.s32.totalorder %s1805_s25, %s1462_s30  ;;  %s1467_s21 = sshll.u32 %s1574_s18, 4  ;;  %s1468_s21 = int_to_ptr.vmem [resolvable:$false] %s1467_s21 }
  0x73   : > { %s1469_s23 = scalar_lea.vmem %s1468_s21, 256  ;;  %p1470_p0 = scmp.lt.s32.totalorder %s1805_s25, %s1468_s21 }
  0x74   : > { %p1465_p7 = pnand %p1463_p5, %p1449_p12  ;;  %p1471_p4 = scmp.lt.s32.totalorder %s1469_s23, %s1462_s30 }
  0x76   : > { %p1466_p9 = pneg %p1465_p7  ;;  %p1472_p2 = por %p1471_p4, %p1470_p0 }
  0x78   : > { %p1473_p8 = pnand %p1472_p2, %p1466_p9 }
  0x7a   : > { %1476 = shalt.err (!%p1473_p8)
}
  0x7b   : > { %1287 = dma.hbm_to_vmem [thread:$0]  (!%p1809_p11), %s1803_s14, 128, %s1805_s25, %s307_s8  }
  0x7c   : > { %p2030_p1 = scmp.ne.s32.totalorder %s2024_s17, 0 }
  0x7d   : > { %s1841_s22 = sand.u32 (!%p2030_p1), 1, %s1551_s28   ;;  %p2031_p12 = scmp.ne.s32.totalorder (!%p2030_p1), %s2021_s15, 0 }
  0x7e   : > { %326 = sbr.rel (%p2030_p1) target bundleno = 1046 (0x416), region = 52  ;;  %s1163_s7 = sshll.u32 (!%p2030_p1), %s1841_s22, 3 }
  0x7f   : > { %s329_s16 = scalar_lea.sflag (!%p2030_p1), [#allocation7], %s1841_s22  ;;  %s332_s12 = scalar_lea.vmem (!%p2030_p1), [#allocation6], %s1163_s7 }
  0x85   : > { %1530 = dma.done.wait (%p2031_p12), %s329_s16, 128  }
  0x86   : > { %1532 = vsyncadd (%p2031_p12), %s329_s16, 4294967168  ;;  %p2032_p13 = scmp.ne.s32.totalorder %s2019_s13, 0 }
  0x88   : > { %1534 = dma.done.wait (%p2032_p13), [#allocation10], 272  }
  0x89   : > { %1536 = vsyncadd (%p2032_p13), [#allocation10], 4294967024 }
  0x8a   : > { %1538 = dma.done.wait (%p2032_p13), [#allocation13], 256  }
  0x8b   : > { %1540 = vsyncadd (%p2032_p13), [#allocation13], 4294967040  ;;  %vm383_vm0 = vcmask 130048   ;;  %v382_v0 = vld [vmem:[%s332_s12] sm:$0xff]  ;;  %v414_v7 = vld [vmem:[#allocation9] sm:$0xff]  ;;  %v1575_v9 = vmov 0.0|0.0   ;;  %v664_v33 = vlaneseq }
  0x8c   : > { %v384_v1 = vsel %vm383_vm0, %v382_v0, 0.0  ;;  %v415_v8 = vld [vmem:[#allocation9 + $0x8] sm:$0xff]  ;;  %1245 = vmatprep.subr.bf16.mxu0 %v1575_v9  ;;  %vm1576_vm1 = vmmov 0   ;;  %v1577_v11 = vmov 0.0   ;;  %v1168_v16 = vld [vmem:[%s2000_s1] ss:$0 sm:$0xff] }
  0x8d   : > { %385 = vadd.xlane.f32.xlu0 %v384_v1  ;;  %v1246_v10 = vpack.c.bf16 %v415_v8, %v414_v7  ;;  %1212 = vmatprep.mubr.msk.f32.mxu0 %vm1576_vm1, %v1577_v11  ;;  %v1169_v18 = vld [vmem:[%s2001_s2] ss:$0 sm:$0xff]  ;;  %v502_v21 = vld [vmem:[#allocation12] sm:$0xff]  ;;  %v503_v22 = vld [vmem:[#allocation12 + $0x8] sm:$0xff]  ;;  %s1578_s26 = smov 112   ;;  %v665_v36 = vshrl.u32 %v664_v33, 7 }
  0x8e   : > { %v1249_v23 = vpack.c.bf16 %v503_v22, %v502_v21  ;;  %v757_v24 = vld [vmem:[%s2004_s5] sm:$0xff]  ;;  %v758_v25 = vld [vmem:[%s2004_s5 + $0x8] sm:$0xff]  ;;  %v1579_v31 = vmov 1966171168   ;;  %vm576_vm2 = vcmask 261120   ;;  %s1167_s30 = sshll.u32 %s1841_s22, 6 }
  0x8f   : > { %1247 = vmatpush3.bf16.msra.mxu0 %v1246_v10  ;;  %v1254_v26 = vpack.c.bf16 %v758_v25, %v757_v24  ;;  %v1170_v27 = vld [vmem:[#allocation11] ss:$0 sm:$0xff]  ;;  %v662_v32 = vunpack.c.l.s4 %v1579_v31  ;;  %v1882_v41 = vsub.s32 0, %v665_v36  ;;  %s2033_s23 = sld [smem:[#allocation22_spill]]  ;;  %s1921_s7 = scalar_lea.vmem [#allocation14], %s1167_s30 }
  0x90   : > { %1248 = vmatprep.subr.bf16.mxu0 %v1575_v9  ;;  %s2034_s16 = sld [smem:[#allocation20_spill]]  ;;  %s1036_s13 = sshll.u32 %s1921_s7, 4  ;;  %s1946_s13 = int_to_ptr.vmem [resolvable:$true] %s1036_s13 }
  0x91   : > { %1255 = vmatprep.subr.bf16.mxu1 %v1254_v26  ;;  %v663_v35 = vunpack.c.0.s8 %v662_v32  ;;  %s2035_s14 = sld [smem:[#allocation23_spill]]  ;;  %s1021_s19 = scalar_lea.sflag [#allocation8], %s1841_s22 }
  0x92   : > { %1257 = vmatpush3.bf16.msra.mxu1 %v1254_v26  ;;  %s1477_s8 = scalar_lea.vmem %s1946_s13, 1024  ;;  %s1580_s24 = smov [#allocation14]  }
  0x93   : > { %v1879_v37 = vsub.s32 %v663_v35, %v665_v36  ;;  %p1478_p11 = scmp.ne.s32.totalorder %s1946_s13, %s1477_s8 }
  0x95   : > { %v1182_v24 = vld [vmem:[%s2033_s23] ss:$0 sm:$0xff]  ;;  %p1479_p6 = pnand %p1478_p11, %p1786_p10 }
  0x96   : > { %s1188_s12 = sshll.u32 %s2034_s16, 10 }
  0x97   : > { %s1944_s25 = scalar_lea.hbm %s2035_s14, %s1188_s12  ;;  %p1480_p3 = pneg %p1479_p6 }
 0x11a   : > { %v386_v2 = vpop.xlane.xlu0 %385 }
 0x11b   : > { %v388_v3 = vmul.f32 0.0625, %v386_v2 }
 0x11d   : > { %v389_v4 = vsub.f32 %v382_v0, %v388_v3 }
 0x11f   : > { %v390_v5 = vmul.f32 %v389_v4, %v389_v4 }
 0x121   : > { %v391_v6 = vsel %vm383_vm0, %v390_v5, 0.0 }
 0x122   : > { %392 = vadd.xlane.f32.xlu0 %v391_v6 }
 0x1af   : > { %v393_v12 = vpop.xlane.xlu0 %392 }
 0x1b0   : > { %v394_v13 = vmul.f32 0.0625, %v393_v12 }
 0x1b2   : > { %v395_v14 = vadd.f32 1e-05, %v394_v13 }
 0x1b4   : > { %1361 = vrsqrt.f32 %v395_v14 }
 0x1be   : > { %v1362_v15 = vpop.eup %1361 }
 0x1bf   : > { %v397_v17 = vmul.f32 %v1362_v15, %v389_v4 }
 0x1c1   : > { %v405_v19 = vmul.f32 %v1168_v16, %v397_v17 }
 0x1c3   : > { %v413_v20 = vadd.f32 %v1169_v18, %v405_v19 }
 0x1c5   : > { %1213 = vmatmul.mubr.msk.f32.vlgmr.msra.gmra.mrb[0].mxu0 %vm383_vm0, %v413_v20 }
 0x1c6   : > { %1219 = vmatprep.mubr.msk.f32.mxu0 %vm1576_vm1, %v1577_v11  ;;  %1250 = vmatpush3.bf16.msra.mxu0 %v1249_v23 }
 0x1c7   : > { %1251 = vmatprep.subr.bf16.mxu0 %v1575_v9 }
 0x298   : > { %v492_v28 = vpop.f32.mrb[0].mxu0 }
 0x299   : > { %v493_v29 = vadd.f32 %v1170_v27, %v492_v28  ;;  %v1214_v30 = vpop.f32.mrb[1].mxu0 }
 0x29b   : > { %496 = vst.msk [vmem:[#allocation2] sm:$0xff] %vm383_vm0, %v493_v29  ;;  %498 = vrot.lane.b32.xlu1 %v493_v29, %s1578_s26  ;;  %1220 = vmatmul.mubr.msk.f32.vlgmr.msra.gmra.mrb[2].mxu0 %vm383_vm0, %v493_v29  ;;  %s1481_s26 = sshll.u32 %s1580_s24, 4  ;;  %s1482_s26 = int_to_ptr.vmem [resolvable:$false] %s1481_s26 }
 0x29c   : > { %1253 = vmatpush3.bf16.msra.mxu0 %v1249_v23  ;;  %1226 = vmatprep.mubr.msk.f32.mxu0 %vm1576_vm1, %v1577_v11  ;;  %s1483_s30 = scalar_lea.vmem %s1482_s26, 2048  ;;  %p1484_p5 = scmp.lt.s32.totalorder %s1946_s13, %s1482_s26 }
 0x29d   : > { %p1485_p7 = scmp.lt.s32.totalorder %s1483_s30, %s1477_s8 }
 0x29f   : > { %p1486_p9 = por %p1485_p7, %p1484_p5 }
 0x2a1   : > { %p1487_p0 = pnand %p1486_p9, %p1480_p3 }
 0x2a2   : > { %v654_v48 = vld [vmem:[#allocation2] sm:$0xff] }
 0x30d   : > { %v499_v34 = vpop.permute.xlu1 %498 }
 0x30e   : > { %501 = vst.msk [vmem:[#allocation3] sm:$0xff] %vm383_vm0, %v499_v34  ;;  %1227 = vmatmul.mubr.msk.f32.vlgmr.msra.gmra.mrb[4].mxu0 %vm383_vm0, %v499_v34 }
 0x315   : > { %v656_v38 = vld [vmem:[#allocation3] sm:$0xff] }
 0x316   : > { %v660_v39 = vcombine.high %v656_v38, %v656_v38  ;;  %v667_v40 = vrot.slane %v656_v38, %v1879_v37 }
 0x318   : > { %v674_v42 = vrot.slane %v660_v39, %v1879_v37  ;;  %v675_v43 = vcombine.high %v667_v40, %v667_v40  ;;  %v683_v44 = vrot.slane %v667_v40, %v1879_v37 }
 0x31a   : > { %v705_v45 = vcombine.high %v683_v44, %v683_v44  ;;  %v712_v46 = vrot.slane %v683_v44, %v1882_v41  ;;  %v697_v47 = vrot.slane %v675_v43, %v1879_v37  ;;  %v690_v49 = vrot.slane %v674_v42, %v1879_v37 }
 0x31b   : > { %v676_v50 = vcombine.high %v674_v42, %v674_v42 }
 0x31c   : > { %v749_v51 = vmul.f32 %v712_v46, %v654_v48  ;;  %v716_v52 = vrot.slane %v697_v47, %v1882_v41  ;;  %v720_v53 = vrot.slane %v705_v45, %v1882_v41  ;;  %v707_v54 = vcombine.high %v697_v47, %v697_v47 }
 0x31d   : > { %v704_v58 = vrot.slane %v676_v50, %v1879_v37  ;;  %v728_v59 = vrot.slane %v690_v49, %v1882_v41  ;;  %v706_v60 = vcombine.high %v690_v49, %v690_v49 }
 0x31e   : > { %1233 = vmatprep.mubr.msk.f32.mxu1 %vm383_vm0, %v749_v51  ;;  %v750_v55 = vmul.f32 %v716_v52, %v654_v48  ;;  %v751_v56 = vmul.f32 %v720_v53, %v654_v48  ;;  %v724_v57 = vrot.slane %v707_v54, %v1882_v41 }
 0x31f   : > { %v732_v62 = vrot.slane %v704_v58, %v1882_v41  ;;  %v708_v63 = vcombine.high %v704_v58, %v704_v58  ;;  %v753_v0 = vmul.f32 %v728_v59, %v654_v48  ;;  %v736_v1 = vrot.slane %v706_v60, %v1882_v41 }
 0x320   : > { %1234 = vmatmul.mubr.msk.f32.vlgmr.msra.gmra.mrb[0].mxu1 %vm383_vm0, %v750_v55  ;;  %v752_v61 = vmul.f32 %v724_v57, %v654_v48 }
 0x321   : > { %1236 = vmatprep.mubr.msk.f32.mxu1 %vm383_vm0, %v751_v56  ;;  %v754_v2 = vmul.f32 %v732_v62, %v654_v48  ;;  %v740_v3 = vrot.slane %v708_v63, %v1882_v41  ;;  %v755_v4 = vmul.f32 %v736_v1, %v654_v48 }
 0x323   : > { %v756_v5 = vmul.f32 %v740_v3, %v654_v48 }
 0x324   : > { %1237 = vmatmul.mubr.msk.f32.gmra.mrb[2].mxu1 %vm383_vm0, %v752_v61 }
 0x325   : > { %1239 = vmatprep.mubr.msk.f32.mxu1 %vm383_vm0, %v753_v0 }
 0x328   : > { %1240 = vmatmul.mubr.msk.f32.gmra.mrb[4].mxu1 %vm383_vm0, %v754_v2 }
 0x329   : > { %1242 = vmatprep.mubr.msk.f32.mxu1 %vm383_vm0, %v755_v4 }
 0x32c   : > { %1243 = vmatmul.mubr.msk.f32.gmra.mrb[6].mxu1 %vm383_vm0, %v756_v5 }
 0x36e   : > { %v572_v6 = vpop.f32.mrb[2].mxu0 }
 0x36f   : > { %577 = vst.msk [vmem:[#allocation4] sm:$0xff] %vm576_vm2, %v572_v6  ;;  %v1221_v7 = vpop.f32.mrb[3].mxu0 }
 0x376   : > { %v889_v18 = vld [vmem:[#allocation4] sm:$0xff] }
 0x3e1   : > { %v648_v8 = vpop.f32.mrb[4].mxu0 }
 0x3e2   : > { %652 = vst.msk [vmem:[#allocation5] sm:$0xff] %vm576_vm2, %v648_v8  ;;  %v1228_v9 = vpop.f32.mrb[5].mxu0 }
 0x3e9   : > { %v658_v10 = vld [vmem:[#allocation5] sm:$0xff] }
 0x3ea   : > { %v906_v11 = vrot.slane %v658_v10, %v1879_v37  ;;  %v899_v13 = vcombine.high %v658_v10, %v658_v10 }
 0x3ec   : > { %v914_v12 = vcombine.high %v906_v11, %v906_v11  ;;  %v913_v15 = vrot.slane %v899_v13, %v1879_v37  ;;  %v922_v16 = vrot.slane %v906_v11, %v1879_v37 }
 0x3ee   : > { %v936_v14 = vrot.slane %v914_v12, %v1879_v37  ;;  %v915_v23 = vcombine.high %v913_v15, %v913_v15  ;;  %v951_v26 = vrot.slane %v922_v16, %v1882_v41  ;;  %v944_v27 = vcombine.high %v922_v16, %v922_v16 }
 0x3ef   : > { %v929_v40 = vrot.slane %v913_v15, %v1879_v37 }
 0x3f0   : > { %v955_v20 = vrot.slane %v936_v14, %v1882_v41  ;;  %v946_v22 = vcombine.high %v936_v14, %v936_v14  ;;  %v943_v35 = vrot.slane %v915_v23, %v1879_v37  ;;  %v959_v39 = vrot.slane %v944_v27, %v1882_v41 }
 0x3f1   : > { %v967_v51 = vrot.slane %v929_v40, %v1882_v41  ;;  %v945_v52 = vcombine.high %v929_v40, %v929_v40 }
 0x3f2   : > { %v963_v33 = vrot.slane %v946_v22, %v1882_v41  ;;  %v971_v47 = vrot.slane %v943_v35, %v1882_v41  ;;  %v947_v49 = vcombine.high %v943_v35, %v943_v35 }
 0x3f3   : > { %v1235_v17 = vpop.f32.mrb[0].mxu1  ;;  %v975_v62 = vrot.slane %v945_v52, %v1882_v41 }
 0x3f4   : > { %v891_v19 = vadd.f32 %v1235_v17, %v889_v18  ;;  %v850_v21 = vpop.f32.mrb[1].mxu1  ;;  %v979_v58 = vrot.slane %v947_v49, %v1882_v41 }
 0x3f5   : > { %v890_v25 = vadd.f32 %v889_v18, %v850_v21 }
 0x3f6   : > { %v989_v28 = vsub.f32 %v891_v19, %v955_v20 }
 0x3f7   : > { %v988_v29 = vsub.f32 %v890_v25, %v951_v26  ;;  %v1238_v30 = vpop.f32.mrb[2].mxu1 }
 0x3f8   : > { %v1004_v31 = vadd.f32 %v1182_v24, %v989_v28  ;;  %v893_v32 = vadd.f32 %v1238_v30, %v889_v18  ;;  %v860_v34 = vpop.f32.mrb[3].mxu1 }
 0x3f9   : > { %v1003_v36 = vadd.f32 %v1182_v24, %v988_v29  ;;  %v892_v38 = vadd.f32 %v889_v18, %v860_v34 }
 0x3fa   : > { %1013 = vst.msk [vmem:[%s1921_s7 + $0x8] sm:$0xff] %vm576_vm2, %v1004_v31  ;;  %v991_v42 = vsub.f32 %v893_v32, %v963_v33 }
 0x3fb   : > { %1012 = vst.msk [vmem:[%s1921_s7] sm:$0xff] %vm576_vm2, %v1003_v36  ;;  %v990_v43 = vsub.f32 %v892_v38, %v959_v39  ;;  %v1241_v44 = vpop.f32.mrb[4].mxu1 }
 0x3fc   : > { %v1006_v45 = vadd.f32 %v1182_v24, %v991_v42  ;;  %v895_v46 = vadd.f32 %v1241_v44, %v889_v18  ;;  %v870_v48 = vpop.f32.mrb[5].mxu1 }
 0x3fd   : > { %v1005_v37 = vadd.f32 %v1182_v24, %v990_v43  ;;  %v894_v50 = vadd.f32 %v889_v18, %v870_v48 }
 0x3fe   : > { %1015 = vst.msk [vmem:[%s1921_s7 + $0x18] sm:$0xff] %vm576_vm2, %v1006_v45  ;;  %v993_v53 = vsub.f32 %v895_v46, %v971_v47 }
 0x3ff   : > { %1014 = vst.msk [vmem:[%s1921_s7 + $0x10] sm:$0xff] %vm576_vm2, %v1005_v37  ;;  %v992_v54 = vsub.f32 %v894_v50, %v967_v51  ;;  %v1244_v55 = vpop.f32.mrb[6].mxu1 }
 0x400   : > { %v1008_v56 = vadd.f32 %v1182_v24, %v993_v53  ;;  %v897_v57 = vadd.f32 %v1244_v55, %v889_v18  ;;  %v880_v59 = vpop.f32.mrb[7].mxu1 }
 0x401   : > { %v1007_v60 = vadd.f32 %v1182_v24, %v992_v54  ;;  %v896_v61 = vadd.f32 %v889_v18, %v880_v59 }
 0x402   : > { %1017 = vst.msk [vmem:[%s1921_s7 + $0x28] sm:$0xff] %vm576_vm2, %v1008_v56  ;;  %v995_v63 = vsub.f32 %v897_v57, %v979_v58 }
 0x403   : > { %1016 = vst.msk [vmem:[%s1921_s7 + $0x20] sm:$0xff] %vm576_vm2, %v1007_v60  ;;  %v994_v0 = vsub.f32 %v896_v61, %v975_v62 }
 0x404   : > { %v1010_v1 = vadd.f32 %v1182_v24, %v995_v63 }
 0x405   : > { %v1009_v41 = vadd.f32 %v1182_v24, %v994_v0 }
 0x406   : > { %1019 = vst.msk [vmem:[%s1921_s7 + $0x38] sm:$0xff] %vm576_vm2, %v1010_v1 }
 0x407   : > { %1018 = vst.msk [vmem:[%s1921_s7 + $0x30] sm:$0xff] %vm576_vm2, %v1009_v41 }
 0x408   : > { %1490 = shalt.err (!%p1487_p0)
}
 0x409   : > { %s1491_s18 = scalar_lea.hbm %s1944_s25, 1024  ;;  %s1495_s7 = scalar_lea.hbm %s2035_s14, 2048 }
 0x40a   : > { %p1492_p4 = scmp.ne.s32.totalorder %s1944_s25, %s1491_s18  ;;  %p1496_p1 = scmp.lt.u32.totalorder %s1944_s25, %s2035_s14 }
 0x40b   : > { %p1497_p12 = scmp.lt.u32.totalorder %s1495_s7, %s1491_s18  ;;  %p1499_p11 = scmp.lt.u32.totalorder %s1491_s18, %s1944_s25 }
 0x40c   : > { %p1493_p2 = pnand %p1492_p4, %p1786_p10 }
 0x40d   : > { %p1498_p13 = por %p1497_p12, %p1496_p1 }
 0x40e   : > { %p1494_p8 = pneg %p1493_p2 }
 0x40f   : > { %p1500_p6 = por %p1499_p11, %p1498_p13 }
 0x411   : > { %p1501_p3 = pnand %p1500_p6, %p1494_p8 }
 0x413   : > { %1504 = shalt.err (!%p1501_p3)
}
 0x414   : > { %s1581_s15 = smov 128   ;;  %s1582_s17 = smov 8  }
 0x415   : > { %1272 = dma.vmem_to_hbm [thread:$0]  (%p1786_p10), %s1946_s13, 1024, %s1944_s25, %s1021_s19, %s1581_s15, %s1581_s15, %s1582_s17  }
 0x416 PF: > { %s2036_s8 = sld [smem:[#allocation19_spill]]  ;;  %s2037_s24 = sld [smem:[#allocation21_spill]] }
 0x417   : > { %p2039_p7 = scmp.ge.s32.totalorder %s1567_s10, 2 }
 0x41c   : > { %s1051_s26 = sand.u32 1, %s2036_s8   ;;  %p2038_p5 = scmp.ne.s32.totalorder %s2037_s24, 0 }
 0x41d   : > { %s1052_s30 = scalar_lea.sflag [#allocation8], %s1051_s26 }
 0x41e   : > { %p1289_p9 = pnand %p2039_p7, %p2038_p5 }
 0x420   : > { %1542 = dma.done.wait (!%p1289_p9), %s1052_s30, 1024  }
 0x421   : > { %1544 = vsyncadd (!%p1289_p9), %s1052_s30, 4294966272  ;;  %s26_s10 = sadd.s32 1, %s1567_s10   ;;  %s2040_s27 = smov %s1551_s28 }
 0x422   : > { %p23_p0 = scmp.ge.s32.totalorder %s26_s10, 4   ;;  %s2041_s28 = smov %s1555_s29 }
 0x423   : > { %s2042_s29 = smov %s1798_s11  ;;  %s2043_s30 = smov %s1563_s9 }
 0x424   : > { %s2044_s9 = smov %s2046_s20  ;;  %25 = sbr.rel (!%p23_p0) target bundleno = 11 (0xb), region = 115 }
 0x42b   :  { %1057 = vsyncpa [#allocation7], 1 }
 0x42c   :  { %1059 = vsyncpa [#allocation7 + $0x1], 1 }
 0x42d   :  { %1060 = vsyncpa [#allocation10], 1 }
 0x42e   :  { %1061 = vsyncpa [#allocation13], 1 }
 0x42f   :  { %1062 = vsyncpa [#allocation8], 1 }
 0x430   :  { %1064 = vsyncpa [#allocation8 + $0x1], 1 }

</bundles_post_ra>
